<compile_context>
chip_gen: v7x
topology: tpu7x:2x2x1
jax: 0.10.0
libtpu: 0.0.40
codegen_flags: <defaults>
</compile_context>

<pallas_src>
import functools

import jax
import jax.numpy as jnp
from jax import lax
from jax.experimental import pallas as pl
from jax.experimental.pallas import tpu as pltpu


def _round_up(x, m):
    return ((x + m - 1) // m) * m


_VMEM_BUDGET = 24 * 1024 * 1024   # keep tile footprint under the scoped limit
_VMEM_LIMIT = 32 * 1024 * 1024    # explicit scoped-VMEM limit, safe on v5e/v6e/v7x


def _num_tensorcores():
    """Best-effort TensorCore count (2 on v7x); falls back to 1."""
    try:
        info = pltpu.get_tpu_info()
        for attr in ("num_cores", "num_tensorcores", "tensorcore_count"):
            v = getattr(info, attr, None)
            if v:
                return int(v)
    except Exception:
        pass
    return 1


def _pick_row_tile(m, per_row_bytes, budget):
    """Largest row tile (all of M, or a pow-of-2 multiple of 8, <=1024) in budget."""
    cap = max(8, budget // max(per_row_bytes, 1))
    if m <= min(cap, 1024):
        return m                       # single full-extent row block
    tm = 8
    while tm * 2 <= min(cap, 1024, m):
        tm *= 2
    return tm


# -----------------------------------------------------------------------------
# Kernels
# -----------------------------------------------------------------------------
def _logreg_kernel(x_ref, w_ref, b_ref, o_ref, *, cast_bf16):
    """Single-K-block kernel: o = x @ w_t + b for one row tile.

    x_ref : (tm, K)      activations in native dtype (cast to bf16 in VMEM)
    w_ref : (K,  N_pad)  weight^T (bf16/f32), resident across the whole grid
    b_ref : (1,  N)      bias, f32, resident
    o_ref : (tm, N)      unpadded output tile
    """
    n = o_ref.shape[-1]
    x = x_ref[...]
    if cast_bf16:
        x = x.astype(jnp.bfloat16)     # VPU cast, hidden under the input DMA
    acc = jnp.dot(x, w_ref[...], preferred_element_type=jnp.float32)
    o_ref[...] = (acc[:, :n] + b_ref[...]).astype(o_ref.dtype)


def _logreg_kernel_ktiled(x_ref, w_ref, b_ref, o_ref, acc_ref, *,
                          cast_bf16, k_total, tk, w_resident, mask_last_k):
    """Fallback for very large ft_in: tile K, accumulate in f32 VMEM scratch."""
    k = pl.program_id(1)
    nk = pl.num_programs(1)

    x = x_ref[...]
    if mask_last_k:
        # Zero the stale tail columns of the ragged last K block: OOB DMA
        # columns contain garbage, and garbage * 0-weight may produce NaN.
        col = lax.broadcasted_iota(jnp.int32, x.shape, 1)
        x = jnp.where(col < (k_total - k * tk), x, jnp.zeros_like(x))
    if cast_bf16:
        x = x.astype(jnp.bfloat16)

    if w_resident:
        w = w_ref[pl.ds(pl.multiple_of(k * tk, tk), tk), :]
    else:
        w = w_ref[...]
    partial = jnp.dot(x, w, preferred_element_type=jnp.float32)

    @pl.when(k == 0)
    def _():
        acc_ref[...] = partial          # no separate zero-fill pass

    @pl.when(k > 0)
    def _():
        acc_ref[...] += partial

    @pl.when(k == nk - 1)
    def _():
        n = o_ref.shape[-1]
        o_ref[...] = (acc_ref[...][:, :n] + b_ref[...]).astype(o_ref.dtype)


# -----------------------------------------------------------------------------
# Wrapper
# -----------------------------------------------------------------------------
def logreg_forward(seq, weight, bias, *, use_bf16=True, interpret=False):
    """seq: (M, ft_in); weight: (nb_classes, ft_in); bias: (nb_classes,)."""
    M, K = seq.shape
    N, K_w = weight.shape
    assert K == K_w and bias.shape == (N,)
    out_dtype = seq.dtype

    # Activations untouched (no host cast / pad).  Only the small weight is
    # prepared on the host: transpose once (so the kernel needs no per-tile
    # transpose), cast, and lane-pad N to a multiple of 128 for the MXU.
    x = seq
    w_dtype = jnp.bfloat16 if use_bf16 else jnp.float32
    cast_bf16 = use_bf16 and x.dtype != jnp.bfloat16
    n_pad = _round_up(N, 128)
    w_t = weight.T.astype(w_dtype)                 # (K, N)
    if n_pad != N:
        w_t = jnp.pad(w_t, ((0, 0), (0, n_pad - N)))
    b = bias.astype(jnp.float32).reshape(1, N)

    x_sz = jnp.dtype(x.dtype).itemsize
    o_sz = jnp.dtype(out_dtype).itemsize
    w_sz = jnp.dtype(w_dtype).itemsize

    cost = pl.CostEstimate(
        flops=2 * M * K * n_pad,
        transcendentals=0,
        bytes_accessed=M * K * x_sz + K * n_pad * w_sz + N * 4 + M * N * o_sz,
    )

    # VMEM footprint of the simple variant: resident weight/bias + double-
    # buffered x row tile + double-buffered (unpadded) output tile.
    w_bytes = K * n_pad * w_sz + N * 4
    per_row = 2 * K * x_sz + 2 * N * o_sz

    if w_bytes + 8 * per_row <= _VMEM_BUDGET:
        # ---- common case: full-K contraction per row tile, weight resident ----
        tm = _pick_row_tile(M, per_row, _VMEM_BUDGET - w_bytes)
        if _num_tensorcores() >= 2 and pl.cdiv(M, tm) == 1 and tm >= 512:
            tm = _round_up(pl.cdiv(tm, 2), 8)      # feed both v7x TensorCores
        grid = (pl.cdiv(M, tm),)
        return pl.pallas_call(
            functools.partial(_logreg_kernel, cast_bf16=cast_bf16),
            out_shape=jax.ShapeDtypeStruct((M, N), out_dtype),
            grid_spec=pltpu.PrefetchScalarGridSpec(
                num_scalar_prefetch=0,
                grid=grid,
                in_specs=[
                    pl.BlockSpec((tm, K), lambda i: (i, 0)),      # activations
                    pl.BlockSpec((K, n_pad), lambda i: (0, 0)),   # weight^T (resident)
                    pl.BlockSpec((1, N), lambda i: (0, 0)),       # bias (resident)
                ],
                out_specs=pl.BlockSpec((tm, N), lambda i: (i, 0)),
            ),
            compiler_params=pltpu.CompilerParams(
                dimension_semantics=("parallel",),
                vmem_limit_bytes=_VMEM_LIMIT,
            ),
            cost_estimate=cost,
            interpret=interpret,
        )(x, w_t, b)

    # ---- fallback for very large ft_in: tile K, f32 accumulation in VMEM ----
    tk = 2048
    k_pad = _round_up(K, tk)
    mask_last_k = (K % tk) != 0
    if k_pad != K:
        w_t = jnp.pad(w_t, ((0, k_pad - K), (0, 0)))   # weight is the small operand
    w_resident = k_pad * n_pad * w_sz <= _VMEM_BUDGET // 3
    w_block_bytes = k_pad * n_pad * w_sz if w_resident else 2 * tk * n_pad * w_sz
    per_row = 2 * tk * x_sz + 2 * N * o_sz + n_pad * 4
    tm = _pick_row_tile(M, per_row, _VMEM_BUDGET - w_block_bytes - N * 4)
    grid = (pl.cdiv(M, tm), k_pad // tk)

    if w_resident:
        w_spec = pl.BlockSpec((k_pad, n_pad), lambda i, k: (0, 0))
    else:
        w_spec = pl.BlockSpec((tk, n_pad), lambda i, k: (k, 0))

    return pl.pallas_call(
        functools.partial(_logreg_kernel_ktiled, cast_bf16=cast_bf16,
                          k_total=K, tk=tk, w_resident=w_resident,
                          mask_last_k=mask_last_k),
        out_shape=jax.ShapeDtypeStruct((M, N), out_dtype),
        grid_spec=pltpu.PrefetchScalarGridSpec(
            num_scalar_prefetch=0,
            grid=grid,
            in_specs=[
                pl.BlockSpec((tm, tk), lambda i, k: (i, k)),      # activations
                w_spec,                                           # weight^T
                pl.BlockSpec((1, N), lambda i, k: (0, 0)),        # bias
            ],
            out_specs=pl.BlockSpec((tm, N), lambda i, k: (i, 0)),
            scratch_shapes=[pltpu.VMEM((tm, n_pad), jnp.float32)],
        ),
        compiler_params=pltpu.CompilerParams(
            dimension_semantics=("parallel", "arbitrary"),
            vmem_limit_bytes=_VMEM_LIMIT,
        ),
        cost_estimate=cost,
        interpret=interpret,
    )(x, w_t, b)


def xavier_uniform(key, shape, dtype=jnp.float32):
    # matches torch.nn.init.xavier_uniform_ for a Linear weight (out, in)
    fan_out, fan_in = shape
    bound = (6.0 / (fan_in + fan_out)) ** 0.5
    return jax.random.uniform(key, shape, dtype, minval=-bound, maxval=bound)


if __name__ == "__main__":
    ft_in, nb_classes, batch = 32, 16, 8

    key = jax.random.PRNGKey(0)
    k_w, k_x = jax.random.split(key)

    # Deterministic parameter init (LogReg.__init__ semantics)
    weight = xavier_uniform(k_w, (nb_classes, ft_in))   # (nb_classes, ft_in)
    bias = jnp.zeros((nb_classes,), jnp.float32)        # filled with 0.0

    seq = jax.random.normal(k_x, (batch, ft_in), jnp.float32)

    # default bf16-operand path (f32 accumulation)
    out = jax.block_until_ready(logreg_forward(seq, weight, bias))
    assert out.shape == (batch, nb_classes)

    # full-f32 path (bit-fidelity with the PyTorch reference, up to accum order)
    out_f32 = jax.block_until_ready(logreg_forward(seq, weight, bias, use_bf16=False))

    ref_f32 = seq @ weight.T + bias
    seq_bf = seq.astype(jnp.bfloat16).astype(jnp.float32)
    w_bf = weight.astype(jnp.bfloat16).astype(jnp.float32)
    ref_bf16 = seq_bf @ w_bf.T + bias

    assert jnp.allclose(out, ref_bf16, atol=1e-4, rtol=1e-4)
    assert jnp.allclose(out, ref_f32, atol=5e-2, rtol=5e-2)
    assert jnp.allclose(out_f32, ref_f32, atol=1e-5, rtol=1e-5)

    print("KERNEL_OK")
</pallas_src>

<mosaic_0001>
module attributes {stable_mosaic.version = 11 : i64} {
  func.func @_logreg_kernel(%arg0: i32, %arg1: memref<8x32xf32, #tpu.memory_space<vmem>>, %arg2: memref<32x128xbf16, #tpu.memory_space<vmem>>, %arg3: memref<1x16xf32, #tpu.memory_space<vmem>>, %arg4: memref<8x16xf32, #tpu.memory_space<vmem>>) attributes {dimension_semantics = [#tpu.dimension_semantics<parallel>], iteration_bounds = array<i64: 1>, scalar_prefetch = 0 : i64, scratch_operands = 0 : i64, tpu.core_type = #tpu.core_type<tc>, window_params = [{transform_indices = @transform_0, window_bounds = array<i64: 8, 32>}, {pipeline_mode = #tpu.pipeline_mode<synchronous>, transform_indices = @transform_1, window_bounds = array<i64: 32, 128>}, {pipeline_mode = #tpu.pipeline_mode<synchronous>, transform_indices = @transform_2, window_bounds = array<i64: 1, 16>}, {transform_indices = @transform_3, window_bounds = array<i64: 8, 16>}]} {
    %c0 = arith.constant 0 : index
    %c0_0 = arith.constant 0 : index
    %0 = vector.load %arg1[%c0, %c0_0] : memref<8x32xf32, #tpu.memory_space<vmem>>, vector<8x32xf32>
    %1 = arith.truncf %0 : vector<8x32xf32> to vector<8x32xbf16>
    %c0_1 = arith.constant 0 : index
    %c0_2 = arith.constant 0 : index
    %2 = vector.load %arg2[%c0_1, %c0_2] : memref<32x128xbf16, #tpu.memory_space<vmem>>, vector<32x128xbf16>
    %cst = arith.constant dense<0.000000e+00> : vector<8x128xf32>
    %3 = tpu.matmul %1, %2, %cst {dimension_numbers = #tpu.dot_dimension_numbers<[1], [0], [0], [1], [0, 0, 1, 1], [], []>} : vector<8x32xbf16>, vector<32x128xbf16>, vector<8x128xf32> -> vector<8x128xf32>
    %4 = vector.extract_strided_slice %3 {offsets = [0, 0], sizes = [8, 16], strides = [1, 1]} : vector<8x128xf32> to vector<8x16xf32>
    %c0_3 = arith.constant 0 : index
    %c0_4 = arith.constant 0 : index
    %5 = vector.load %arg3[%c0_3, %c0_4] : memref<1x16xf32, #tpu.memory_space<vmem>>, vector<1x16xf32>
    %6 = vector.broadcast %5 : vector<1x16xf32> to vector<8x16xf32>
    %7 = arith.addf %4, %6 : vector<8x16xf32>
    %c0_5 = arith.constant 0 : index
    %c0_6 = arith.constant 0 : index
    %8 = vector.load %arg4[%c0_5, %c0_6] : memref<8x16xf32, #tpu.memory_space<vmem>>, vector<8x16xf32>
    tpu.vector_store %arg4[%c0_5, %c0_6], %7 {strides = array<i32>} : memref<8x16xf32, #tpu.memory_space<vmem>>, vector<8x16xf32>,
    return
  }
  func.func @transform_0(%arg0: i32) -> (i32, i32) {
    %c0_i32 = arith.constant 0 : i32
    %c0_i32_0 = arith.constant 0 : i32
    return %arg0, %c0_i32 : i32, i32
  }
  func.func @transform_1(%arg0: i32) -> (i32, i32) {
    %c0_i32 = arith.constant 0 : i32
    %c0_i32_0 = arith.constant 0 : i32
    %c0_i32_1 = arith.constant 0 : i32
    return %c0_i32, %c0_i32_0 : i32, i32
  }
  func.func @transform_2(%arg0: i32) -> (i32, i32) {
    %c0_i32 = arith.constant 0 : i32
    %c0_i32_0 = arith.constant 0 : i32
    %c0_i32_1 = arith.constant 0 : i32
    return %c0_i32, %c0_i32_0 : i32, i32
  }
  func.func @transform_3(%arg0: i32) -> (i32, i32) {
    %c0_i32 = arith.constant 0 : i32
    %c0_i32_0 = arith.constant 0 : i32
    return %arg0, %c0_i32 : i32, i32
  }
}

</mosaic_0001>

<bundles_post_ra>
// kernel: tpu_custom_call.1
= control target key start
LH: loop header
LB: loop body
LE: loop exit
PB: predicated region body
PF: predicated region fallthrough
CT: control target
= control target key end

     0   :  { %8 = vsyncpa [#allocation3], 0  ;;  %s299_s0 = inlined_call_operand.hbm [shape: f32[8,32], index: 0, kind: input, shape index: {}]   ;;  %s300_s1 = inlined_call_operand.hbm [shape: bf16[32,128], index: 1, kind: input, shape index: {}]   ;;  %s301_s2 = inlined_call_operand.vmem [shape: f32[1,16], index: 2, kind: input, shape index: {}]   ;;  %s302_s3 = inlined_call_operand.hbm [shape: f32[8,16], index: 3, kind: output, shape index: {}]  }
   0x1   :  { %9 = vsyncpa [#allocation6], 0 }
   0x2   :  { %10 = vsyncpa [#allocation4], 0  ;;  %s226_s12 = smov [#allocation2]   ;;  %s227_s14 = smov [#allocation5]  }
   0x3   :  { %s17_s13 = sshll.u32 %s226_s12, 4  ;;  %s26_s15 = sshll.u32 %s227_s14, 4  ;;  %s18_s13 = int_to_ptr.vmem [resolvable:$true] %s17_s13  ;;  %s253_s15 = int_to_ptr.vmem [resolvable:$true] %s26_s15 }
   0x4   :  { %s154_s18 = scalar_lea.hbm %s299_s0, 128 }
   0x5   :  { %p155_p0 = scmp.ne.s32.totalorder %s299_s0, %s154_s18  ;;  %p158_p1 = scmp.lt.u32.totalorder %s154_s18, %s299_s0 }
   0x7   :  { %p160_p2 = pnand %p158_p1, %p155_p0 }
   0x9   :  { %163 = shalt.err (!%p160_p2)
}
   0xa   :  { %s164_s23 = scalar_lea.vmem %s18_s13, 128  ;;  %p169_p4 = scmp.lt.s32.totalorder %s18_s13, %s18_s13 }
   0xb   :  { %p165_p3 = scmp.ne.s32.totalorder %s18_s13, %s164_s23  ;;  %p170_p5 = scmp.lt.s32.totalorder %s164_s23, %s164_s23 }
   0xd   :  { %p171_p6 = por %p170_p5, %p169_p4 }
   0xf   :  { %p172_p7 = pnand %p171_p6, %p165_p3 }
  0x11   :  { %175 = shalt.err (!%p172_p7)
}
  0x12   :  { %20 = dma.hbm_to_vmem [thread:$0]  %s299_s0, 128, %s18_s13, [#allocation3]  }
  0x13   :  { %s176_s28 = scalar_lea.hbm %s300_s1, 256 }
  0x14   :  { %p177_p8 = scmp.ne.s32.totalorder %s300_s1, %s176_s28  ;;  %p180_p9 = scmp.lt.u32.totalorder %s176_s28, %s300_s1 }
  0x16   :  { %p182_p10 = pnand %p180_p9, %p177_p8 }
  0x18   :  { %185 = shalt.err (!%p182_p10)
}
  0x19   :  { %s186_s6 = scalar_lea.vmem %s253_s15, 256  ;;  %p191_p12 = scmp.lt.s32.totalorder %s253_s15, %s253_s15 }
  0x1a   :  { %p187_p11 = scmp.ne.s32.totalorder %s253_s15, %s186_s6  ;;  %p192_p13 = scmp.lt.s32.totalorder %s186_s6, %s186_s6 }
  0x1c   :  { %p193_p0 = por %p192_p13, %p191_p12 }
  0x1e   :  { %p194_p1 = pnand %p193_p0, %p187_p11 }
  0x20   :  { %197 = shalt.err (!%p194_p1)
}
  0x21   :  { %s228_s0 = smov 64   ;;  %s229_s7 = smov 4  }
  0x22   :  { %32 = dma.hbm_to_vmem [thread:$0]  %s300_s1, 256, %s253_s15, [#allocation6], %s228_s0, %s228_s0, %s229_s7  }
  0x23   :  { %220 = dma.done.wait [#allocation3], 128  }
  0x24   :  { %221 = vsyncadd [#allocation3], 4294967168 }
  0x25   :  { %222 = dma.done.wait [#allocation6], 256  }
  0x26   :  { %223 = vsyncadd [#allocation6], 4294967040  ;;  %v230_v0 = vmov 0.0   ;;  %vm231_vm0 = vmmov 0   ;;  %v152_v1 = vld [vmem:[#allocation5] sm:$0xff]   ;;  %v153_v2 = vld [vmem:[#allocation5 + $0x8] sm:$0xff]  }
  0x27   :  { %137 = vmatprep.subr.bf16.mxu0 %v230_v0  ;;  %141 = vmatprep.mubr.msk.bf16.mxu0 %vm231_vm0, %v230_v0  ;;  %v42_v3 = vld [vmem:[#allocation2] sm:$0xff]  ;;  %vm60_vm1 = vcmask 261120   ;;  %s232_s1 = smov [#allocation7]   ;;  %vm112_vm2 = vcmask 130048  }
  0x28   :  { %138 = vmatpush3.bf16.msra.mxu0 %v152_v1  ;;  %v43_v4 = vpack.c.bf16 %v42_v3, %v42_v3  ;;  %v133_v5 = vld [vmem:[%s301_s2] ss:$0 sm:$0xff]  ;;  %s120_s12 = sshll.u32 %s232_s1, 4  ;;  %s121_s12 = int_to_ptr.vmem [resolvable:$true] %s120_s12 }
  0x29   :  { %139 = vmatprep.subr.bf16.mxu0 %v230_v0  ;;  %s198_s13 = scalar_lea.vmem %s121_s12, 128  ;;  %p203_p3 = scmp.lt.s32.totalorder %s121_s12, %s121_s12 }
  0x2a   :  { %p199_p2 = scmp.ne.s32.totalorder %s121_s12, %s198_s13  ;;  %p204_p4 = scmp.lt.s32.totalorder %s198_s13, %s198_s13 }
  0x2c   :  { %140 = vmatpush3.bf16.msra.mxu0 %v153_v2  ;;  %p205_p5 = por %p204_p4, %p203_p3 }
  0x2e   :  { %p206_p6 = pnand %p205_p5, %p199_p2 }
  0x2f   :  { %142 = vmatmul.mubr.msk.bf16.vlgmr.msra.gmra.mrb[0].mxu0 %vm60_vm1, %v43_v4 }
 0x102   :  { %v98_v6 = vpop.f32.mrb[0].mxu0 }
 0x103   :  { %v111_v7 = vadd.f32 %v133_v5, %v98_v6  ;;  %v143_v8 = vpop.f32.mrb[1].mxu0 }
 0x104   :  { %v101_v9 = vpop.f32.mrb[2].mxu0 }
 0x105   :  { %v144_v10 = vpop.f32.mrb[3].mxu0  ;;  %113 = vst.msk [vmem:[#allocation7] sm:$0xff] %vm112_vm2, %v111_v7 }
 0x106   :  { %209 = shalt.err (!%p206_p6)
}
 0x107   :  { %s210_s2 = scalar_lea.hbm %s302_s3, 128 }
 0x108   :  { %p211_p7 = scmp.ne.s32.totalorder %s302_s3, %s210_s2  ;;  %p214_p8 = scmp.lt.u32.totalorder %s210_s2, %s302_s3 }
 0x10a   :  { %p216_p9 = pnand %p214_p8, %p211_p7 }
 0x10c   :  { %219 = shalt.err (!%p216_p9)
}
 0x10d   :  { %123 = dma.vmem_to_hbm [thread:$0]  %s121_s12, 128, %s302_s3, [#allocation4]  }
 0x10e   :  { %224 = dma.done.wait [#allocation4], 128  }
 0x10f   :  { %225 = vsyncadd [#allocation4], 4294967168 }
 0x110   :  { %127 = vsyncpa [#allocation3], 1 }
 0x111   :  { %128 = vsyncpa [#allocation6], 1 }
 0x112   :  { %129 = vsyncpa [#allocation4], 1 }

</bundles_post_ra>
